<compile_context>
chip_gen: v5e
topology: v5e:2x2
jax: 0.10.0
libtpu: 0.0.40
codegen_flags: <defaults>
</compile_context>

<pallas_src>
import functools

import jax
import jax.numpy as jnp
from jax.experimental import pallas as pl
from jax.experimental.pallas import tpu as pltpu


def _mrrmse_kernel(p_ref, t_ref, o_ref, ssq_ref, *, d_true):
    j = pl.program_id(1)

    @pl.when(j == 0)
    def _():
        ssq_ref[...] = jnp.zeros_like(ssq_ref)

    # Hot path: elementwise diff/square (VPU) + cross-lane row reduce (XLU),
    # fully hidden under the HBM stream at these tile sizes.
    diff = p_ref[...].astype(jnp.float32) - t_ref[...].astype(jnp.float32)
    ssq_ref[...] += jnp.sum(diff * diff, axis=1, keepdims=True)

    @pl.when(j == pl.num_programs(1) - 1)
    def _():
        # Divide by the TRUE feature dim (zero padding added nothing to ssq).
        o_ref[...] = jnp.sqrt(ssq_ref[...] * jnp.float32(1.0 / d_true))


def _round_up(x, m):
    return ((x + m - 1) // m) * m


def mrrmse_loss(predictions, targets, *, tile_rows=None, tile_cols=None):
    assert predictions.shape == targets.shape
    N, D = predictions.shape

    # Row tile: big (HBM roofline), multiple of 16 (covers f32/bf16 sublane
    # tiling).  Column tile: lane-dense multiple of 128.
    if tile_rows is None:
        tile_rows = min(512, _round_up(N, 16))
    if tile_cols is None:
        tile_cols = min(1024, _round_up(D, 128))

    n_pad = _round_up(N, tile_rows)
    d_pad = _round_up(D, tile_cols)
    if (n_pad, d_pad) != (N, D):
        # Zero padding is exact: padded cells give diff == 0, and the mean
        # uses the true D / true N below.
        pad = ((0, n_pad - N), (0, d_pad - D))
        predictions = jnp.pad(predictions, pad)
        targets = jnp.pad(targets, pad)

    grid = (n_pad // tile_rows, d_pad // tile_cols)
    kernel = functools.partial(_mrrmse_kernel, d_true=float(D))

    rmse = pl.pallas_call(
        kernel,
        out_shape=jax.ShapeDtypeStruct((n_pad, 1), jnp.float32),
        grid_spec=pltpu.PrefetchScalarGridSpec(
            num_scalar_prefetch=0,
            grid=grid,
            in_specs=[
                pl.BlockSpec((tile_rows, tile_cols), lambda i, j: (i, j)),
                pl.BlockSpec((tile_rows, tile_cols), lambda i, j: (i, j)),
            ],
            out_specs=pl.BlockSpec((tile_rows, 1), lambda i, j: (i, 0)),
            scratch_shapes=[pltpu.VMEM((tile_rows, 1), jnp.float32)],
        ),
        compiler_params=pltpu.CompilerParams(
            # Row tiles independent -> megacore-shardable on v7x;
            # D axis carries the running sum-of-squares -> sequential.
            dimension_semantics=("parallel", "arbitrary"),
            # ~8.6 MiB actually used; raise above v5e's 16 MiB default while
            # staying well under v7x's 64 MiB physical VMEM.
            vmem_limit_bytes=32 * 1024 * 1024,
        ),
    )(predictions, targets)

    # Tiny final reduction outside the kernel (padded rows are exactly 0).
    return jnp.sum(rmse[:N, 0]) / jnp.float32(N)


def mrrmse_ref(predictions, targets):
    rmse_per_row = jnp.sqrt(jnp.mean((predictions - targets) ** 2, axis=1))
    return jnp.mean(rmse_per_row)


if __name__ == "__main__":
    key = jax.random.PRNGKey(0)
    k1, k2 = jax.random.split(key)
    N, D = 16, 256  # small (batch, feature) loss inputs
    predictions = jax.random.normal(k1, (N, D), dtype=jnp.float32)
    targets = jax.random.normal(k2, (N, D), dtype=jnp.float32)

    loss = mrrmse_loss(predictions, targets)
    jax.block_until_ready(loss)

    ref = mrrmse_ref(predictions, targets)
    assert jnp.allclose(loss, ref, rtol=1e-5, atol=1e-6), (loss, ref)

    # Also exercise a ragged shape (non-multiple N and D) to cover the
    # padding/masking path.
    N2, D2 = 37, 300
    p2 = jax.random.normal(k1, (N2, D2), dtype=jnp.float32)
    t2 = jax.random.normal(k2, (N2, D2), dtype=jnp.float32)
    loss2 = mrrmse_loss(p2, t2)
    jax.block_until_ready(loss2)
    ref2 = mrrmse_ref(p2, t2)
    assert jnp.allclose(loss2, ref2, rtol=1e-5, atol=1e-6), (loss2, ref2)

    print("KERNEL_OK")
</pallas_src>

<mosaic_0001>
module attributes {stable_mosaic.version = 11 : i64} {
  func.func @_mrrmse_kernel(%arg0: i32, %arg1: i32, %arg2: memref<16x256xf32, #tpu.memory_space<vmem>>, %arg3: memref<16x256xf32, #tpu.memory_space<vmem>>, %arg4: memref<16x1xf32, #tpu.memory_space<vmem>>, %arg5: memref<16x1xf32, #tpu.memory_space<vmem>>) attributes {dimension_semantics = [#tpu.dimension_semantics<parallel>, #tpu.dimension_semantics<arbitrary>], iteration_bounds = array<i64: 1, 1>, scalar_prefetch = 0 : i64, scratch_operands = 1 : i64, tpu.core_type = #tpu.core_type<tc>, window_params = [{transform_indices = @transform_0, window_bounds = array<i64: 16, 256>}, {transform_indices = @transform_1, window_bounds = array<i64: 16, 256>}, {transform_indices = @transform_2, window_bounds = array<i64: 16, 1>}]} {
    %c0_i32 = arith.constant 0 : i32
    %0 = arith.cmpi eq, %arg1, %c0_i32 : i32
    %1 = arith.extui %0 : i1 to i32
    %c0_i32_0 = arith.constant 0 : i32
    %2 = arith.cmpi ne, %1, %c0_i32_0 : i32
    scf.if %2 {
      %cst_10 = arith.constant 0.000000e+00 : f32
      %15 = vector.broadcast %cst_10 : f32 to vector<16x1xf32>
      %c0_11 = arith.constant 0 : index
      %c0_12 = arith.constant 0 : index
      %16 = vector.load %arg5[%c0_11, %c0_12] : memref<16x1xf32, #tpu.memory_space<vmem>>, vector<16x1xf32>
      tpu.vector_store %arg5[%c0_11, %c0_12], %15 {strides = array<i32>} : memref<16x1xf32, #tpu.memory_space<vmem>>, vector<16x1xf32>,
    } else {
    }
    %c0 = arith.constant 0 : index
    %c0_1 = arith.constant 0 : index
    %3 = vector.load %arg2[%c0, %c0_1] : memref<16x256xf32, #tpu.memory_space<vmem>>, vector<16x256xf32>
    %c0_2 = arith.constant 0 : index
    %c0_3 = arith.constant 0 : index
    %4 = vector.load %arg3[%c0_2, %c0_3] : memref<16x256xf32, #tpu.memory_space<vmem>>, vector<16x256xf32>
    %5 = arith.subf %3, %4 : vector<16x256xf32>
    %c0_4 = arith.constant 0 : index
    %c0_5 = arith.constant 0 : index
    %6 = vector.load %arg5[%c0_4, %c0_5] : memref<16x1xf32, #tpu.memory_space<vmem>>, vector<16x1xf32>
    %7 = arith.mulf %5, %5 : vector<16x256xf32>
    %cst = arith.constant dense<0.000000e+00> : vector<16xf32>
    %8 = vector.multi_reduction <add>, %7, %cst [1] : vector<16x256xf32> to vector<16xf32>
    %9 = vector.shape_cast %8 : vector<16xf32> to vector<16x1xf32>
    %10 = arith.addf %6, %9 : vector<16x1xf32>
    %c0_6 = arith.constant 0 : index
    %c0_7 = arith.constant 0 : index
    %11 = vector.load %arg5[%c0_6, %c0_7] : memref<16x1xf32, #tpu.memory_space<vmem>>, vector<16x1xf32>
    tpu.vector_store %arg5[%c0_6, %c0_7], %10 {strides = array<i32>} : memref<16x1xf32, #tpu.memory_space<vmem>>, vector<16x1xf32>,
    %c0_i32_8 = arith.constant 0 : i32
    %12 = arith.cmpi eq, %arg1, %c0_i32_8 : i32
    %13 = arith.extui %12 : i1 to i32
    %c0_i32_9 = arith.constant 0 : i32
    %14 = arith.cmpi ne, %13, %c0_i32_9 : i32
    scf.if %14 {
      %c0_10 = arith.constant 0 : index
      %c0_11 = arith.constant 0 : index
      %15 = vector.load %arg5[%c0_10, %c0_11] : memref<16x1xf32, #tpu.memory_space<vmem>>, vector<16x1xf32>
      %cst_12 = arith.constant 3.906250e-03 : f32
      %16 = vector.broadcast %cst_12 : f32 to vector<16x1xf32>
      %17 = arith.mulf %15, %16 : vector<16x1xf32>
      %18 = math.sqrt %17 : vector<16x1xf32>
      %c0_13 = arith.constant 0 : index
      %c0_14 = arith.constant 0 : index
      %19 = vector.load %arg4[%c0_13, %c0_14] : memref<16x1xf32, #tpu.memory_space<vmem>>, vector<16x1xf32>
      tpu.vector_store %arg4[%c0_13, %c0_14], %18 {strides = array<i32>} : memref<16x1xf32, #tpu.memory_space<vmem>>, vector<16x1xf32>,
    } else {
    }
    return
  }
  func.func @transform_0(%arg0: i32, %arg1: i32) -> (i32, i32) {
    %c0_i32 = arith.constant 0 : i32
    return %arg0, %arg1 : i32, i32
  }
  func.func @transform_1(%arg0: i32, %arg1: i32) -> (i32, i32) {
    %c0_i32 = arith.constant 0 : i32
    return %arg0, %arg1 : i32, i32
  }
  func.func @transform_2(%arg0: i32, %arg1: i32) -> (i32, i32) {
    %c0_i32 = arith.constant 0 : i32
    %c0_i32_0 = arith.constant 0 : i32
    return %arg0, %c0_i32 : i32, i32
  }
}

</mosaic_0001>

<bundles_post_ra>
// kernel: tpu_custom_call.1
= control target key start
LH: loop header
LB: loop body
LE: loop exit
PB: predicated region body
PF: predicated region fallthrough
CT: control target
= control target key end

     0   :  { %7 = vsyncpa [#allocation4], 0  ;;  %s217_s0 = inlined_call_operand.hbm [shape: f32[16,256], index: 0, kind: input, shape index: {}]   ;;  %s218_s1 = inlined_call_operand.hbm [shape: f32[16,256], index: 1, kind: input, shape index: {}]   ;;  %s219_s2 = inlined_call_operand.vmem [shape: f32[16,1], index: 2, kind: output, shape index: {}]  }
   0x1   :  { %s13_s11 = sshll.u32 %s217_s0, 4  ;;  %s14_s11 = int_to_ptr.hbm [resolvable:$true] %s13_s11 }
   0x2   :  { %8 = vsyncpa [#allocation6], 0  ;;  %s179_s12 = smov [#allocation3]   ;;  %s26_s16 = sshll.u32 %s218_s1, 4  ;;  %s27_s16 = int_to_ptr.hbm [resolvable:$true] %s26_s16 }
   0x3   :  { %s15_s13 = sshll.u32 %s179_s12, 4  ;;  %s180_s17 = smov 256   ;;  %s16_s13 = int_to_ptr.vmem [resolvable:$true] %s15_s13 }
   0x4   :  { %s181_s18 = smov 16   ;;  %s182_s19 = smov [#allocation5]  }
   0x5   :  { %21 = dma.hbm_to_vmem [thread:$0]  %s14_s11, 512, %s16_s13, [#allocation4], %s180_s17, %s180_s17, %s181_s18  }
   0x6   :  { %s28_s20 = sshll.u32 %s182_s19, 4  ;;  %s29_s20 = int_to_ptr.vmem [resolvable:$true] %s28_s20 }
   0x7   :  { %34 = dma.hbm_to_vmem [thread:$0]  %s27_s16, 512, %s29_s20, [#allocation6], %s180_s17, %s180_s17, %s181_s18  }
   0x8   :  { %175 = dma.done.wait [#allocation4], 512  }
   0x9   :  { %176 = vsyncadd [#allocation4], 4294966784 }
   0xa   :  { %177 = dma.done.wait [#allocation6], 512  }
   0xb   :  { %178 = vsyncadd [#allocation6], 4294966784  ;;  %vm47_vm0 = vcmask 7168   ;;  %v183_v0 = vmov 0.0   ;;  %v50_v1 = vld [vmem:[#allocation3] sm:$0xff]  ;;  %v51_v2 = vld [vmem:[#allocation3 + $0x8] sm:$0xff] }
   0xc   :  { %48 = vst.msk [vmem:[#allocation2] sm:$0xff] %vm47_vm0, %v183_v0  ;;  %v54_v3 = vld [vmem:[#allocation5] sm:$0xff]  ;;  %v55_v4 = vld [vmem:[#allocation5 + $0x8] sm:$0xff]  ;;  %v52_v6 = vld [vmem:[#allocation3 + $0x10] sm:$0xff] }
   0xd   :  { %49 = vst.msk [vmem:[#allocation2 + $0x8] sm:$0xff] %vm47_vm0, %v183_v0  ;;  %v58_v5 = vsub.f32 %v50_v1, %v54_v3  ;;  %v53_v7 = vld [vmem:[#allocation3 + $0x18] sm:$0xff]  ;;  %v59_v8 = vsub.f32 %v51_v2, %v55_v4  ;;  %v56_v9 = vld [vmem:[#allocation5 + $0x10] sm:$0xff] }
   0xe   :  { %v57_v10 = vld [vmem:[#allocation5 + $0x18] sm:$0xff]  ;;  %v60_v13 = vsub.f32 %v52_v6, %v56_v9 }
   0xf   :  { %v64_v11 = vmul.f32 %v58_v5, %v58_v5  ;;  %v65_v12 = vmul.f32 %v59_v8, %v59_v8  ;;  %v61_v14 = vsub.f32 %v53_v7, %v57_v10 }
  0x10   :  { %v66_v16 = vmul.f32 %v60_v13, %v60_v13 }
  0x11   :  { %v68_v15 = vadd.f32 %v65_v12, %v64_v11  ;;  %v67_v17 = vmul.f32 %v61_v14, %v61_v14 }
  0x13   :  { %69 = vadd.xlane.f32.xlu0 %v68_v15  ;;  %v71_v18 = vadd.f32 %v67_v17, %v66_v16  ;;  %v62_v19 = vld [vmem:[#allocation2] sm:$0xff] }
  0x14   :  { %v63_v22 = vld [vmem:[#allocation2 + $0x8] sm:$0xff] }
  0x1b   :  { %72 = vadd.xlane.f32.xlu0 %v71_v18 }
  0x86   :  { %v70_v20 = vpop.xlane.xlu0 %69 }
  0x87   :  { %v74_v21 = vadd.f32 %v70_v20, %v62_v19 }
  0x89   :  { %77 = vst.msk [vmem:[#allocation2] sm:$0xff] %vm47_vm0, %v74_v21 }
  0x8e   :  { %v73_v23 = vpop.xlane.xlu0 %72 }
  0x8f   :  { %v75_v24 = vadd.f32 %v73_v23, %v63_v22 }
  0x90   :  { %v82_v25 = vld [vmem:[#allocation2] sm:$0xff] }
  0x91   :  { %v84_v26 = vmul.f32 0.00390625, %v82_v25  ;;  %78 = vst.msk [vmem:[#allocation2 + $0x8] sm:$0xff] %vm47_vm0, %v75_v24 }
  0x93   :  { %123 = vrsqrt.f32 %v84_v26  ;;  %vm93_vm1 = vcmp.eq.f32.partialorder %v84_v26, inf  ;;  %v96_v39 = vand.u32 2147483648, %v84_v26  ;;  %vm95_vm2 = vcmp.eq.f32.partialorder %v84_v26, 0.0 }
  0x98   :  { %v83_v27 = vld [vmem:[#allocation2 + $0x8] sm:$0xff] }
  0x99   :  { %v124_v28 = vpop.eup %123  ;;  %v85_v29 = vmul.f32 0.00390625, %v83_v27 }
  0x9a   :  { %v87_v30 = vmul.f32 %v124_v28, %v84_v26 }
  0x9b   :  { %125 = vrsqrt.f32 %v85_v29  ;;  %vm105_vm3 = vcmp.eq.f32.partialorder %v85_v29, inf  ;;  %v108_v46 = vand.u32 2147483648, %v85_v29  ;;  %vm107_vm4 = vcmp.eq.f32.partialorder %v85_v29, 0.0 }
  0x9c   :  { %v88_v31 = vmul.f32 %v124_v28, %v87_v30 }
  0x9e   :  { %v89_v32 = vmul.f32 0.5, %v88_v31 }
  0xa0   :  { %v90_v33 = vsub.f32 1.5, %v89_v32 }
  0xa1   :  { %v126_v34 = vpop.eup %125 }
  0xa2   :  { %v91_v35 = vmul.f32 %v124_v28, %v90_v33  ;;  %v99_v36 = vmul.f32 %v126_v34, %v85_v29 }
  0xa4   :  { %v92_v37 = vmul.f32 %v91_v35, %v84_v26  ;;  %v100_v38 = vmul.f32 %v126_v34, %v99_v36 }
  0xa6   :  { %v94_v40 = vsel %vm93_vm1, %v84_v26, %v92_v37  ;;  %v101_v41 = vmul.f32 0.5, %v100_v38 }
  0xa7   :  { %v97_v42 = vsel %vm95_vm2, %v96_v39, %v94_v40 }
  0xa8   :  { %110 = vst.msk [vmem:[%s219_s2] sm:$0xff] %vm47_vm0, %v97_v42  ;;  %v102_v43 = vsub.f32 1.5, %v101_v41 }
  0xaa   :  { %v103_v44 = vmul.f32 %v126_v34, %v102_v43 }
  0xac   :  { %v104_v45 = vmul.f32 %v103_v44, %v85_v29 }
  0xae   :  { %v106_v47 = vsel %vm105_vm3, %v85_v29, %v104_v45 }
  0xaf   :  { %v109_v48 = vsel %vm107_vm4, %v108_v46, %v106_v47 }
  0xb0   :  { %111 = vst.msk [vmem:[%s219_s2 + $0x8] sm:$0xff] %vm47_vm0, %v109_v48 }
  0xb1   :  { %116 = vsyncpa [#allocation4], 1 }
  0xb2   :  { %117 = vsyncpa [#allocation6], 1 }

</bundles_post_ra>
